<compile_context>
chip_gen: v7x
topology: tpu7x:2x2x1
jax: 0.10.0
libtpu: 0.0.40
codegen_flags: <defaults>
</compile_context>

<pallas_src>
import functools

import numpy as np
import jax
import jax.numpy as jnp
from jax.experimental import pallas as pl
from jax.experimental.pallas import tpu as pltpu


def _round_up(x, m):
    return ((x + m - 1) // m) * m


# ----------------------------------------------------------------------------
# Kernel: full GRU recurrence + MLP prediction head for one batch tile
# ----------------------------------------------------------------------------
def predict_kernel(
    x_ref,        # (T, Bt, F)  time-major jet features for this batch tile
    wx_ref,       # (F, 3H)     [W_zx | W_rx | W_hx] (pre-transposed)
    bx_ref,       # (1, 3H)     folded gate biases (b_*x + b_*h)
    wzr_ref,      # (H, 2H)     [W_zh | W_rh] (pre-transposed)
    whh_ref,      # (H, H)      W_hh (pre-transposed)
    w1_ref, b1_ref,   # (H, H), (1, H)   fc1
    w2_ref, b2_ref,   # (H, H), (1, H)   fc2
    w3_ref, b3_ref,   # (H, 1), (1, 1)   fc3
    out_ref,      # (Bt, 1)
):
    T, Bt, F = x_ref.shape
    H = whh_ref.shape[0]

    # ---- input-side projections hoisted out of the recurrence (one matmul) ----
    # (T, Bt, F) -> (T*Bt, F) is layout-free because Bt is a multiple of 8.
    x_all = x_ref[...].reshape(T * Bt, F)
    xp = (
        jnp.dot(x_all, wx_ref[...], preferred_element_type=jnp.float32)
        + bx_ref[...]
    )                                             # (T*Bt, 3H), biases folded
    xp = xp.reshape(T, Bt, 3 * H)

    h = jnp.zeros((Bt, H), dtype=jnp.float32)

    # GRU recurrence (reference iterates jets in reverse order: index T-1-t).
    # T is small and static (n_jets_per_event = 4), so a fully-unrolled Python
    # loop is fine; switch to lax.fori_loop if T grows beyond a handful.
    for t in range(T):
        g = xp[T - 1 - t]                         # (Bt, 3H) pre-projected xt
        zr = jax.nn.sigmoid(
            jnp.dot(h, wzr_ref[...], preferred_element_type=jnp.float32)
            + g[:, : 2 * H]
        )
        z = zr[:, :H]
        r = zr[:, H:]
        h_cand = jnp.maximum(
            jnp.dot(r * h, whh_ref[...], preferred_element_type=jnp.float32)
            + g[:, 2 * H:],
            0.0,
        )
        h = (1.0 - z) * h + z * h_cand

    # Prediction head: fc1 -> relu -> fc2 -> relu -> fc3 -> sigmoid
    a1 = jnp.maximum(
        jnp.dot(h, w1_ref[...], preferred_element_type=jnp.float32) + b1_ref[...],
        0.0,
    )
    a2 = jnp.maximum(
        jnp.dot(a1, w2_ref[...], preferred_element_type=jnp.float32) + b2_ref[...],
        0.0,
    )
    logits = jnp.dot(a2, w3_ref[...], preferred_element_type=jnp.float32) + b3_ref[...]
    out_ref[...] = jax.nn.sigmoid(logits)


# ----------------------------------------------------------------------------
# One-time parameter preparation (transpose / concat / bias folding)
# ----------------------------------------------------------------------------
def prepare_params(params):
    """Build the kernel weight layout ONCE; cache the result across calls."""
    H = params["W_zh"].shape[0]
    f32 = jnp.float32
    W_x_all = jnp.concatenate(
        [params["W_zx"].T, params["W_rx"].T, params["W_hx"].T], axis=1
    ).astype(f32)                                               # (F, 3H)
    b_all = jnp.concatenate(
        [
            params["b_zx"] + params["b_zh"],
            params["b_rx"] + params["b_rh"],
            params["b_hx"] + params["b_hh"],
        ]
    ).reshape(1, 3 * H).astype(f32)                             # (1, 3H)
    W_zr_h = jnp.concatenate(
        [params["W_zh"].T, params["W_rh"].T], axis=1
    ).astype(f32)                                               # (H, 2H)
    W_hh = params["W_hh"].T.astype(f32)                         # (H, H)
    W1 = params["W_1"].T.astype(f32)
    b1 = params["b_1"].reshape(1, H).astype(f32)
    W2 = params["W_2"].T.astype(f32)
    b2 = params["b_2"].reshape(1, H).astype(f32)
    W3 = params["W_3"].T.astype(f32)                            # (H, 1)
    b3 = params["b_3"].reshape(1, 1).astype(f32)
    return (W_x_all, b_all, W_zr_h, W_hh, W1, b1, W2, b2, W3, b3)


# ----------------------------------------------------------------------------
# Wrapper: grid over the batch dimension, weights VMEM-resident
# ----------------------------------------------------------------------------
@functools.partial(jax.jit, static_argnames=("b_tile",))
def predict_forward(h_jets, prepared, b_tile=128):
    """h_jets: (B, T, F) float32.  Returns (B, 1) float32 sigmoid output."""
    B, T, F = h_jets.shape
    W_x_all, b_all, W_zr_h, W_hh, W1, b1, W2, b2, W3, b3 = prepared
    H = W_hh.shape[0]

    # Batch tiling: 128 rows per tile for real batches; small batches are
    # padded up to a multiple of 8 sublanes and handled in one grid step.
    bt = b_tile if B >= b_tile else _round_up(max(B, 1), 8)
    B_pad = _round_up(B, bt)
    n_blocks = B_pad // bt

    # Time-major layout: makes the per-tile (T, Bt, F)->(T*Bt, F) reshape in
    # the kernel layout-free and per-timestep slicing a leading-dim index.
    x = jnp.transpose(h_jets.astype(jnp.float32), (1, 0, 2))    # (T, B, F)
    if B_pad != B:
        x = jnp.pad(x, ((0, 0), (0, B_pad - B), (0, 0)))

    const2 = lambda i: (0, 0)
    out = pl.pallas_call(
        predict_kernel,
        out_shape=jax.ShapeDtypeStruct((B_pad, 1), jnp.float32),
        grid=(n_blocks,),
        in_specs=[
            pl.BlockSpec((T, bt, F), lambda i: (0, i, 0)),      # x tile
            pl.BlockSpec((F, 3 * H), const2),                   # W_x_all
            pl.BlockSpec((1, 3 * H), const2),                   # b_all
            pl.BlockSpec((H, 2 * H), const2),                   # W_zr_h
            pl.BlockSpec((H, H), const2),                       # W_hh
            pl.BlockSpec((H, H), const2),                       # W1
            pl.BlockSpec((1, H), const2),                       # b1
            pl.BlockSpec((H, H), const2),                       # W2
            pl.BlockSpec((1, H), const2),                       # b2
            pl.BlockSpec((H, 1), const2),                       # W3
            pl.BlockSpec((1, 1), const2),                       # b3
        ],
        out_specs=pl.BlockSpec((bt, 1), lambda i: (i, 0)),
        compiler_params=pltpu.CompilerParams(
            dimension_semantics=("parallel",),                  # v7x: 2 TCs
        ),
    )(x, W_x_all, b_all, W_zr_h, W_hh, W1, b1, W2, b2, W3, b3)
    return out[:B]


# ----------------------------------------------------------------------------
# Deterministic parameter initialization (mirrors module __init__ shapes)
# ----------------------------------------------------------------------------
def _xavier_uniform(key, shape, gain):
    fan_out, fan_in = shape
    a = gain * np.sqrt(6.0 / (fan_in + fan_out))
    return jax.random.uniform(key, shape, jnp.float32, -a, a)


def _orthogonal(key, shape, gain):
    n = max(shape)
    a = jax.random.normal(key, (n, n), jnp.float32)
    q, r = jnp.linalg.qr(a)
    q = q * jnp.sign(jnp.diagonal(r))
    return (gain * q[: shape[0], : shape[1]]).astype(jnp.float32)


def _bias(key, fan_in, n):
    bound = 1.0 / np.sqrt(fan_in)
    return jax.random.uniform(key, (n,), jnp.float32, -bound, bound)


def init_params(key, n_features_rnn, n_hidden_rnn):
    gain = np.sqrt(2.0)  # calculate_gain('relu')
    ks = jax.random.split(key, 24)
    F, H = n_features_rnn, n_hidden_rnn
    params = {
        # GRU gates
        "W_zx": _xavier_uniform(ks[0], (H, F), gain), "b_zx": _bias(ks[1], F, H),
        "W_zh": _orthogonal(ks[2], (H, H), gain),     "b_zh": _bias(ks[3], H, H),
        "W_rx": _xavier_uniform(ks[4], (H, F), gain), "b_rx": _bias(ks[5], F, H),
        "W_rh": _orthogonal(ks[6], (H, H), gain),     "b_rh": _bias(ks[7], H, H),
        "W_hx": _xavier_uniform(ks[8], (H, F), gain), "b_hx": _bias(ks[9], F, H),
        "W_hh": _orthogonal(ks[10], (H, H), gain),    "b_hh": _bias(ks[11], H, H),
        # prediction head
        "W_1": _xavier_uniform(ks[12], (H, H), gain), "b_1": _bias(ks[13], H, H),
        "W_2": _xavier_uniform(ks[14], (H, H), gain), "b_2": _bias(ks[15], H, H),
        "W_3": _xavier_uniform(ks[16], (1, H), gain),
        "b_3": jnp.ones((1,), jnp.float32),           # nn.init.constant(fc3.bias, 1)
    }
    return params


# ----------------------------------------------------------------------------
# Pure-JAX reference (same math) for a sanity check
# ----------------------------------------------------------------------------
def predict_reference(h_jets, params):
    B, T, F = h_jets.shape
    H = params["W_zh"].shape[0]
    h = jnp.zeros((B, H), jnp.float32)
    for t in range(T):
        xt = h_jets[:, T - 1 - t, :]
        z = jax.nn.sigmoid(h @ params["W_zh"].T + params["b_zh"]
                           + xt @ params["W_zx"].T + params["b_zx"])
        r = jax.nn.sigmoid(h @ params["W_rh"].T + params["b_rh"]
                           + xt @ params["W_rx"].T + params["b_rx"])
        hc = jax.nn.relu((r * h) @ params["W_hh"].T + params["b_hh"]
                         + xt @ params["W_hx"].T + params["b_hx"])
        h = (1.0 - z) * h + z * hc
    a1 = jax.nn.relu(h @ params["W_1"].T + params["b_1"])
    a2 = jax.nn.relu(a1 @ params["W_2"].T + params["b_2"])
    return jax.nn.sigmoid(a2 @ params["W_3"].T + params["b_3"])


if __name__ == "__main__":
    # small shapes: batch=2 events, n_jets_per_event=4, n_features_rnn=32,
    # n_hidden_rnn=32 (n_features_embedding / n_hidden_embedding enter only
    # through the untranslated RecNN stage).
    B, T, F, H = 2, 4, 32, 32

    key = jax.random.PRNGKey(0)
    k_x, k_p = jax.random.split(key)
    h_jets = jax.random.normal(k_x, (B, T, F), jnp.float32)
    params = init_params(k_p, F, H)

    prepared = prepare_params(params)          # one-time weight prep (cached)
    out = predict_forward(h_jets, prepared)
    out = jax.block_until_ready(out)

    ref = predict_reference(h_jets, params)
    np.testing.assert_allclose(np.asarray(out), np.asarray(ref), rtol=1e-5, atol=1e-5)

    assert out.shape == (B, 1)
    print("KERNEL_OK")
</pallas_src>

<mosaic_0001>
module attributes {stable_mosaic.version = 11 : i64} {
  func.func @predict_kernel(%arg0: i32, %arg1: memref<4x8x32xf32, #tpu.memory_space<vmem>>, %arg2: memref<32x96xf32, #tpu.memory_space<vmem>>, %arg3: memref<1x96xf32, #tpu.memory_space<vmem>>, %arg4: memref<32x64xf32, #tpu.memory_space<vmem>>, %arg5: memref<32x32xf32, #tpu.memory_space<vmem>>, %arg6: memref<32x32xf32, #tpu.memory_space<vmem>>, %arg7: memref<1x32xf32, #tpu.memory_space<vmem>>, %arg8: memref<32x32xf32, #tpu.memory_space<vmem>>, %arg9: memref<1x32xf32, #tpu.memory_space<vmem>>, %arg10: memref<32x1xf32, #tpu.memory_space<vmem>>, %arg11: memref<1x1xf32, #tpu.memory_space<vmem>>, %arg12: memref<8x1xf32, #tpu.memory_space<vmem>>) attributes {dimension_semantics = [#tpu.dimension_semantics<parallel>], iteration_bounds = array<i64: 1>, scalar_prefetch = 0 : i64, scratch_operands = 0 : i64, tpu.core_type = #tpu.core_type<tc>, window_params = [{transform_indices = @transform_0, window_bounds = array<i64: 4, 8, 32>}, {pipeline_mode = #tpu.pipeline_mode<synchronous>, transform_indices = @transform_1, window_bounds = array<i64: 32, 96>}, {pipeline_mode = #tpu.pipeline_mode<synchronous>, transform_indices = @transform_2, window_bounds = array<i64: 1, 96>}, {pipeline_mode = #tpu.pipeline_mode<synchronous>, transform_indices = @transform_3, window_bounds = array<i64: 32, 64>}, {pipeline_mode = #tpu.pipeline_mode<synchronous>, transform_indices = @transform_4, window_bounds = array<i64: 32, 32>}, {pipeline_mode = #tpu.pipeline_mode<synchronous>, transform_indices = @transform_5, window_bounds = array<i64: 32, 32>}, {pipeline_mode = #tpu.pipeline_mode<synchronous>, transform_indices = @transform_6, window_bounds = array<i64: 1, 32>}, {pipeline_mode = #tpu.pipeline_mode<synchronous>, transform_indices = @transform_7, window_bounds = array<i64: 32, 32>}, {pipeline_mode = #tpu.pipeline_mode<synchronous>, transform_indices = @transform_8, window_bounds = array<i64: 1, 32>}, {pipeline_mode = #tpu.pipeline_mode<synchronous>, transform_indices = @transform_9, window_bounds = array<i64: 32, 1>}, {pipeline_mode = #tpu.pipeline_mode<synchronous>, transform_indices = @transform_10, window_bounds = array<i64: 1, 1>}, {transform_indices = @transform_11, window_bounds = array<i64: 8, 1>}]} {
    %c0 = arith.constant 0 : index
    %c0_0 = arith.constant 0 : index
    %c0_1 = arith.constant 0 : index
    %0 = vector.load %arg1[%c0, %c0_0, %c0_1] : memref<4x8x32xf32, #tpu.memory_space<vmem>>, vector<4x8x32xf32>
    %1 = vector.shape_cast %0 : vector<4x8x32xf32> to vector<32x32xf32>
    %c0_2 = arith.constant 0 : index
    %c0_3 = arith.constant 0 : index
    %2 = vector.load %arg2[%c0_2, %c0_3] : memref<32x96xf32, #tpu.memory_space<vmem>>, vector<32x96xf32>
    %cst = arith.constant dense<0.000000e+00> : vector<32x96xf32>
    %3 = tpu.matmul %1, %2, %cst {dimension_numbers = #tpu.dot_dimension_numbers<[1], [0], [0], [1], [0, 0, 1, 1], [], []>} : vector<32x32xf32>, vector<32x96xf32>, vector<32x96xf32> -> vector<32x96xf32>
    %c0_4 = arith.constant 0 : index
    %c0_5 = arith.constant 0 : index
    %4 = vector.load %arg3[%c0_4, %c0_5] : memref<1x96xf32, #tpu.memory_space<vmem>>, vector<1x96xf32>
    %5 = vector.broadcast %4 : vector<1x96xf32> to vector<32x96xf32>
    %6 = arith.addf %3, %5 : vector<32x96xf32>
    %7 = vector.shape_cast %6 : vector<32x96xf32> to vector<4x8x96xf32>
    %cst_6 = arith.constant 0.000000e+00 : f32
    %8 = vector.broadcast %cst_6 : f32 to vector<8x32xf32>
    %9 = vector.extract_strided_slice %7 {offsets = [3, 0, 0], sizes = [1, 8, 96], strides = [1, 1, 1]} : vector<4x8x96xf32> to vector<1x8x96xf32>
    %10 = vector.shape_cast %9 : vector<1x8x96xf32> to vector<8x96xf32>
    %c0_7 = arith.constant 0 : index
    %c0_8 = arith.constant 0 : index
    %11 = vector.load %arg4[%c0_7, %c0_8] : memref<32x64xf32, #tpu.memory_space<vmem>>, vector<32x64xf32>
    %cst_9 = arith.constant dense<0.000000e+00> : vector<8x64xf32>
    %12 = tpu.matmul %8, %11, %cst_9 {dimension_numbers = #tpu.dot_dimension_numbers<[1], [0], [0], [1], [0, 0, 1, 1], [], []>} : vector<8x32xf32>, vector<32x64xf32>, vector<8x64xf32> -> vector<8x64xf32>
    %13 = vector.extract_strided_slice %10 {offsets = [0, 0], sizes = [8, 64], strides = [1, 1]} : vector<8x96xf32> to vector<8x64xf32>
    %14 = arith.addf %12, %13 : vector<8x64xf32>
    %15 = arith.negf %14 : vector<8x64xf32>
    %16 = math.exp %15 : vector<8x64xf32>
    %cst_10 = arith.constant 1.000000e+00 : f32
    %17 = vector.broadcast %cst_10 : f32 to vector<8x64xf32>
    %18 = arith.addf %17, %16 : vector<8x64xf32>
    %19 = arith.divf %17, %18 : vector<8x64xf32>
    %20 = vector.extract_strided_slice %19 {offsets = [0, 0], sizes = [8, 32], strides = [1, 1]} : vector<8x64xf32> to vector<8x32xf32>
    %21 = vector.extract_strided_slice %19 {offsets = [0, 32], sizes = [8, 32], strides = [1, 1]} : vector<8x64xf32> to vector<8x32xf32>
    %22 = arith.mulf %21, %8 : vector<8x32xf32>
    %c0_11 = arith.constant 0 : index
    %c0_12 = arith.constant 0 : index
    %23 = vector.load %arg5[%c0_11, %c0_12] : memref<32x32xf32, #tpu.memory_space<vmem>>, vector<32x32xf32>
    %cst_13 = arith.constant dense<0.000000e+00> : vector<8x32xf32>
    %24 = tpu.matmul %22, %23, %cst_13 {dimension_numbers = #tpu.dot_dimension_numbers<[1], [0], [0], [1], [0, 0, 1, 1], [], []>} : vector<8x32xf32>, vector<32x32xf32>, vector<8x32xf32> -> vector<8x32xf32>
    %25 = vector.extract_strided_slice %10 {offsets = [0, 64], sizes = [8, 32], strides = [1, 1]} : vector<8x96xf32> to vector<8x32xf32>
    %26 = arith.addf %24, %25 : vector<8x32xf32>
    %cst_14 = arith.constant 0.000000e+00 : f32
    %27 = vector.broadcast %cst_14 : f32 to vector<8x32xf32>
    %28 = arith.maximumf %26, %27 : vector<8x32xf32>
    %cst_15 = arith.constant 1.000000e+00 : f32
    %29 = vector.broadcast %cst_15 : f32 to vector<8x32xf32>
    %30 = arith.subf %29, %20 : vector<8x32xf32>
    %31 = arith.mulf %30, %8 : vector<8x32xf32>
    %32 = arith.mulf %20, %28 : vector<8x32xf32>
    %33 = arith.addf %31, %32 : vector<8x32xf32>
    %34 = vector.extract_strided_slice %7 {offsets = [2, 0, 0], sizes = [1, 8, 96], strides = [1, 1, 1]} : vector<4x8x96xf32> to vector<1x8x96xf32>
    %35 = vector.shape_cast %34 : vector<1x8x96xf32> to vector<8x96xf32>
    %c0_16 = arith.constant 0 : index
    %c0_17 = arith.constant 0 : index
    %36 = vector.load %arg4[%c0_16, %c0_17] : memref<32x64xf32, #tpu.memory_space<vmem>>, vector<32x64xf32>
    %cst_18 = arith.constant dense<0.000000e+00> : vector<8x64xf32>
    %37 = tpu.matmul %33, %36, %cst_18 {dimension_numbers = #tpu.dot_dimension_numbers<[1], [0], [0], [1], [0, 0, 1, 1], [], []>} : vector<8x32xf32>, vector<32x64xf32>, vector<8x64xf32> -> vector<8x64xf32>
    %38 = vector.extract_strided_slice %35 {offsets = [0, 0], sizes = [8, 64], strides = [1, 1]} : vector<8x96xf32> to vector<8x64xf32>
    %39 = arith.addf %37, %38 : vector<8x64xf32>
    %40 = arith.negf %39 : vector<8x64xf32>
    %41 = math.exp %40 : vector<8x64xf32>
    %cst_19 = arith.constant 1.000000e+00 : f32
    %42 = vector.broadcast %cst_19 : f32 to vector<8x64xf32>
    %43 = arith.addf %42, %41 : vector<8x64xf32>
    %44 = arith.divf %42, %43 : vector<8x64xf32>
    %45 = vector.extract_strided_slice %44 {offsets = [0, 0], sizes = [8, 32], strides = [1, 1]} : vector<8x64xf32> to vector<8x32xf32>
    %46 = vector.extract_strided_slice %44 {offsets = [0, 32], sizes = [8, 32], strides = [1, 1]} : vector<8x64xf32> to vector<8x32xf32>
    %47 = arith.mulf %46, %33 : vector<8x32xf32>
    %c0_20 = arith.constant 0 : index
    %c0_21 = arith.constant 0 : index
    %48 = vector.load %arg5[%c0_20, %c0_21] : memref<32x32xf32, #tpu.memory_space<vmem>>, vector<32x32xf32>
    %cst_22 = arith.constant dense<0.000000e+00> : vector<8x32xf32>
    %49 = tpu.matmul %47, %48, %cst_22 {dimension_numbers = #tpu.dot_dimension_numbers<[1], [0], [0], [1], [0, 0, 1, 1], [], []>} : vector<8x32xf32>, vector<32x32xf32>, vector<8x32xf32> -> vector<8x32xf32>
    %50 = vector.extract_strided_slice %35 {offsets = [0, 64], sizes = [8, 32], strides = [1, 1]} : vector<8x96xf32> to vector<8x32xf32>
    %51 = arith.addf %49, %50 : vector<8x32xf32>
    %cst_23 = arith.constant 0.000000e+00 : f32
    %52 = vector.broadcast %cst_23 : f32 to vector<8x32xf32>
    %53 = arith.maximumf %51, %52 : vector<8x32xf32>
    %cst_24 = arith.constant 1.000000e+00 : f32
    %54 = vector.broadcast %cst_24 : f32 to vector<8x32xf32>
    %55 = arith.subf %54, %45 : vector<8x32xf32>
    %56 = arith.mulf %55, %33 : vector<8x32xf32>
    %57 = arith.mulf %45, %53 : vector<8x32xf32>
    %58 = arith.addf %56, %57 : vector<8x32xf32>
    %59 = vector.extract_strided_slice %7 {offsets = [1, 0, 0], sizes = [1, 8, 96], strides = [1, 1, 1]} : vector<4x8x96xf32> to vector<1x8x96xf32>
    %60 = vector.shape_cast %59 : vector<1x8x96xf32> to vector<8x96xf32>
    %c0_25 = arith.constant 0 : index
    %c0_26 = arith.constant 0 : index
    %61 = vector.load %arg4[%c0_25, %c0_26] : memref<32x64xf32, #tpu.memory_space<vmem>>, vector<32x64xf32>
    %cst_27 = arith.constant dense<0.000000e+00> : vector<8x64xf32>
    %62 = tpu.matmul %58, %61, %cst_27 {dimension_numbers = #tpu.dot_dimension_numbers<[1], [0], [0], [1], [0, 0, 1, 1], [], []>} : vector<8x32xf32>, vector<32x64xf32>, vector<8x64xf32> -> vector<8x64xf32>
    %63 = vector.extract_strided_slice %60 {offsets = [0, 0], sizes = [8, 64], strides = [1, 1]} : vector<8x96xf32> to vector<8x64xf32>
    %64 = arith.addf %62, %63 : vector<8x64xf32>
    %65 = arith.negf %64 : vector<8x64xf32>
    %66 = math.exp %65 : vector<8x64xf32>
    %cst_28 = arith.constant 1.000000e+00 : f32
    %67 = vector.broadcast %cst_28 : f32 to vector<8x64xf32>
    %68 = arith.addf %67, %66 : vector<8x64xf32>
    %69 = arith.divf %67, %68 : vector<8x64xf32>
    %70 = vector.extract_strided_slice %69 {offsets = [0, 0], sizes = [8, 32], strides = [1, 1]} : vector<8x64xf32> to vector<8x32xf32>
    %71 = vector.extract_strided_slice %69 {offsets = [0, 32], sizes = [8, 32], strides = [1, 1]} : vector<8x64xf32> to vector<8x32xf32>
    %72 = arith.mulf %71, %58 : vector<8x32xf32>
    %c0_29 = arith.constant 0 : index
    %c0_30 = arith.constant 0 : index
    %73 = vector.load %arg5[%c0_29, %c0_30] : memref<32x32xf32, #tpu.memory_space<vmem>>, vector<32x32xf32>
    %cst_31 = arith.constant dense<0.000000e+00> : vector<8x32xf32>
    %74 = tpu.matmul %72, %73, %cst_31 {dimension_numbers = #tpu.dot_dimension_numbers<[1], [0], [0], [1], [0, 0, 1, 1], [], []>} : vector<8x32xf32>, vector<32x32xf32>, vector<8x32xf32> -> vector<8x32xf32>
    %75 = vector.extract_strided_slice %60 {offsets = [0, 64], sizes = [8, 32], strides = [1, 1]} : vector<8x96xf32> to vector<8x32xf32>
    %76 = arith.addf %74, %75 : vector<8x32xf32>
    %cst_32 = arith.constant 0.000000e+00 : f32
    %77 = vector.broadcast %cst_32 : f32 to vector<8x32xf32>
    %78 = arith.maximumf %76, %77 : vector<8x32xf32>
    %cst_33 = arith.constant 1.000000e+00 : f32
    %79 = vector.broadcast %cst_33 : f32 to vector<8x32xf32>
    %80 = arith.subf %79, %70 : vector<8x32xf32>
    %81 = arith.mulf %80, %58 : vector<8x32xf32>
    %82 = arith.mulf %70, %78 : vector<8x32xf32>
    %83 = arith.addf %81, %82 : vector<8x32xf32>
    %84 = vector.extract_strided_slice %7 {offsets = [0, 0, 0], sizes = [1, 8, 96], strides = [1, 1, 1]} : vector<4x8x96xf32> to vector<1x8x96xf32>
    %85 = vector.shape_cast %84 : vector<1x8x96xf32> to vector<8x96xf32>
    %c0_34 = arith.constant 0 : index
    %c0_35 = arith.constant 0 : index
    %86 = vector.load %arg4[%c0_34, %c0_35] : memref<32x64xf32, #tpu.memory_space<vmem>>, vector<32x64xf32>
    %cst_36 = arith.constant dense<0.000000e+00> : vector<8x64xf32>
    %87 = tpu.matmul %83, %86, %cst_36 {dimension_numbers = #tpu.dot_dimension_numbers<[1], [0], [0], [1], [0, 0, 1, 1], [], []>} : vector<8x32xf32>, vector<32x64xf32>, vector<8x64xf32> -> vector<8x64xf32>
    %88 = vector.extract_strided_slice %85 {offsets = [0, 0], sizes = [8, 64], strides = [1, 1]} : vector<8x96xf32> to vector<8x64xf32>
    %89 = arith.addf %87, %88 : vector<8x64xf32>
    %90 = arith.negf %89 : vector<8x64xf32>
    %91 = math.exp %90 : vector<8x64xf32>
    %cst_37 = arith.constant 1.000000e+00 : f32
    %92 = vector.broadcast %cst_37 : f32 to vector<8x64xf32>
    %93 = arith.addf %92, %91 : vector<8x64xf32>
    %94 = arith.divf %92, %93 : vector<8x64xf32>
    %95 = vector.extract_strided_slice %94 {offsets = [0, 0], sizes = [8, 32], strides = [1, 1]} : vector<8x64xf32> to vector<8x32xf32>
    %96 = vector.extract_strided_slice %94 {offsets = [0, 32], sizes = [8, 32], strides = [1, 1]} : vector<8x64xf32> to vector<8x32xf32>
    %97 = arith.mulf %96, %83 : vector<8x32xf32>
    %c0_38 = arith.constant 0 : index
    %c0_39 = arith.constant 0 : index
    %98 = vector.load %arg5[%c0_38, %c0_39] : memref<32x32xf32, #tpu.memory_space<vmem>>, vector<32x32xf32>
    %cst_40 = arith.constant dense<0.000000e+00> : vector<8x32xf32>
    %99 = tpu.matmul %97, %98, %cst_40 {dimension_numbers = #tpu.dot_dimension_numbers<[1], [0], [0], [1], [0, 0, 1, 1], [], []>} : vector<8x32xf32>, vector<32x32xf32>, vector<8x32xf32> -> vector<8x32xf32>
    %100 = vector.extract_strided_slice %85 {offsets = [0, 64], sizes = [8, 32], strides = [1, 1]} : vector<8x96xf32> to vector<8x32xf32>
    %101 = arith.addf %99, %100 : vector<8x32xf32>
    %cst_41 = arith.constant 0.000000e+00 : f32
    %102 = vector.broadcast %cst_41 : f32 to vector<8x32xf32>
    %103 = arith.maximumf %101, %102 : vector<8x32xf32>
    %cst_42 = arith.constant 1.000000e+00 : f32
    %104 = vector.broadcast %cst_42 : f32 to vector<8x32xf32>
    %105 = arith.subf %104, %95 : vector<8x32xf32>
    %106 = arith.mulf %105, %83 : vector<8x32xf32>
    %107 = arith.mulf %95, %103 : vector<8x32xf32>
    %108 = arith.addf %106, %107 : vector<8x32xf32>
    %c0_43 = arith.constant 0 : index
    %c0_44 = arith.constant 0 : index
    %109 = vector.load %arg6[%c0_43, %c0_44] : memref<32x32xf32, #tpu.memory_space<vmem>>, vector<32x32xf32>
    %cst_45 = arith.constant dense<0.000000e+00> : vector<8x32xf32>
    %110 = tpu.matmul %108, %109, %cst_45 {dimension_numbers = #tpu.dot_dimension_numbers<[1], [0], [0], [1], [0, 0, 1, 1], [], []>} : vector<8x32xf32>, vector<32x32xf32>, vector<8x32xf32> -> vector<8x32xf32>
    %c0_46 = arith.constant 0 : index
    %c0_47 = arith.constant 0 : index
    %111 = vector.load %arg7[%c0_46, %c0_47] : memref<1x32xf32, #tpu.memory_space<vmem>>, vector<1x32xf32>
    %112 = vector.broadcast %111 : vector<1x32xf32> to vector<8x32xf32>
    %113 = arith.addf %110, %112 : vector<8x32xf32>
    %cst_48 = arith.constant 0.000000e+00 : f32
    %114 = vector.broadcast %cst_48 : f32 to vector<8x32xf32>
    %115 = arith.maximumf %113, %114 : vector<8x32xf32>
    %c0_49 = arith.constant 0 : index
    %c0_50 = arith.constant 0 : index
    %116 = vector.load %arg8[%c0_49, %c0_50] : memref<32x32xf32, #tpu.memory_space<vmem>>, vector<32x32xf32>
    %cst_51 = arith.constant dense<0.000000e+00> : vector<8x32xf32>
    %117 = tpu.matmul %115, %116, %cst_51 {dimension_numbers = #tpu.dot_dimension_numbers<[1], [0], [0], [1], [0, 0, 1, 1], [], []>} : vector<8x32xf32>, vector<32x32xf32>, vector<8x32xf32> -> vector<8x32xf32>
    %c0_52 = arith.constant 0 : index
    %c0_53 = arith.constant 0 : index
    %118 = vector.load %arg9[%c0_52, %c0_53] : memref<1x32xf32, #tpu.memory_space<vmem>>, vector<1x32xf32>
    %119 = vector.broadcast %118 : vector<1x32xf32> to vector<8x32xf32>
    %120 = arith.addf %117, %119 : vector<8x32xf32>
    %cst_54 = arith.constant 0.000000e+00 : f32
    %121 = vector.broadcast %cst_54 : f32 to vector<8x32xf32>
    %122 = arith.maximumf %120, %121 : vector<8x32xf32>
    %c0_55 = arith.constant 0 : index
    %c0_56 = arith.constant 0 : index
    %123 = vector.load %arg10[%c0_55, %c0_56] : memref<32x1xf32, #tpu.memory_space<vmem>>, vector<32x1xf32>
    %cst_57 = arith.constant dense<0.000000e+00> : vector<8x1xf32>
    %124 = tpu.matmul %122, %123, %cst_57 {dimension_numbers = #tpu.dot_dimension_numbers<[1], [0], [0], [1], [0, 0, 1, 1], [], []>} : vector<8x32xf32>, vector<32x1xf32>, vector<8x1xf32> -> vector<8x1xf32>
    %c0_58 = arith.constant 0 : index
    %c0_59 = arith.constant 0 : index
    %125 = vector.load %arg11[%c0_58, %c0_59] : memref<1x1xf32, #tpu.memory_space<vmem>>, vector<1x1xf32>
    %126 = vector.broadcast %125 : vector<1x1xf32> to vector<8x1xf32>
    %127 = arith.addf %124, %126 : vector<8x1xf32>
    %128 = arith.negf %127 : vector<8x1xf32>
    %129 = math.exp %128 : vector<8x1xf32>
    %cst_60 = arith.constant 1.000000e+00 : f32
    %130 = vector.broadcast %cst_60 : f32 to vector<8x1xf32>
    %131 = arith.addf %130, %129 : vector<8x1xf32>
    %132 = arith.divf %130, %131 : vector<8x1xf32>
    %c0_61 = arith.constant 0 : index
    %c0_62 = arith.constant 0 : index
    %133 = vector.load %arg12[%c0_61, %c0_62] : memref<8x1xf32, #tpu.memory_space<vmem>>, vector<8x1xf32>
    tpu.vector_store %arg12[%c0_61, %c0_62], %132 {strides = array<i32>} : memref<8x1xf32, #tpu.memory_space<vmem>>, vector<8x1xf32>,
    return
  }
  func.func @transform_0(%arg0: i32) -> (i32, i32, i32) {
    %c0_i32 = arith.constant 0 : i32
    %c0_i32_0 = arith.constant 0 : i32
    %c0_i32_1 = arith.constant 0 : i32
    return %c0_i32, %arg0, %c0_i32_0 : i32, i32, i32
  }
  func.func @transform_1(%arg0: i32) -> (i32, i32) {
    %c0_i32 = arith.constant 0 : i32
    %c0_i32_0 = arith.constant 0 : i32
    %c0_i32_1 = arith.constant 0 : i32
    return %c0_i32, %c0_i32_0 : i32, i32
  }
  func.func @transform_2(%arg0: i32) -> (i32, i32) {
    %c0_i32 = arith.constant 0 : i32
    %c0_i32_0 = arith.constant 0 : i32
    %c0_i32_1 = arith.constant 0 : i32
    return %c0_i32, %c0_i32_0 : i32, i32
  }
  func.func @transform_3(%arg0: i32) -> (i32, i32) {
    %c0_i32 = arith.constant 0 : i32
    %c0_i32_0 = arith.constant 0 : i32
    %c0_i32_1 = arith.constant 0 : i32
    return %c0_i32, %c0_i32_0 : i32, i32
  }
  func.func @transform_4(%arg0: i32) -> (i32, i32) {
    %c0_i32 = arith.constant 0 : i32
    %c0_i32_0 = arith.constant 0 : i32
    %c0_i32_1 = arith.constant 0 : i32
    return %c0_i32, %c0_i32_0 : i32, i32
  }
  func.func @transform_5(%arg0: i32) -> (i32, i32) {
    %c0_i32 = arith.constant 0 : i32
    %c0_i32_0 = arith.constant 0 : i32
    %c0_i32_1 = arith.constant 0 : i32
    return %c0_i32, %c0_i32_0 : i32, i32
  }
  func.func @transform_6(%arg0: i32) -> (i32, i32) {
    %c0_i32 = arith.constant 0 : i32
    %c0_i32_0 = arith.constant 0 : i32
    %c0_i32_1 = arith.constant 0 : i32
    return %c0_i32, %c0_i32_0 : i32, i32
  }
  func.func @transform_7(%arg0: i32) -> (i32, i32) {
    %c0_i32 = arith.constant 0 : i32
    %c0_i32_0 = arith.constant 0 : i32
    %c0_i32_1 = arith.constant 0 : i32
    return %c0_i32, %c0_i32_0 : i32, i32
  }
  func.func @transform_8(%arg0: i32) -> (i32, i32) {
    %c0_i32 = arith.constant 0 : i32
    %c0_i32_0 = arith.constant 0 : i32
    %c0_i32_1 = arith.constant 0 : i32
    return %c0_i32, %c0_i32_0 : i32, i32
  }
  func.func @transform_9(%arg0: i32) -> (i32, i32) {
    %c0_i32 = arith.constant 0 : i32
    %c0_i32_0 = arith.constant 0 : i32
    %c0_i32_1 = arith.constant 0 : i32
    return %c0_i32, %c0_i32_0 : i32, i32
  }
  func.func @transform_10(%arg0: i32) -> (i32, i32) {
    %c0_i32 = arith.constant 0 : i32
    %c0_i32_0 = arith.constant 0 : i32
    %c0_i32_1 = arith.constant 0 : i32
    return %c0_i32, %c0_i32_0 : i32, i32
  }
  func.func @transform_11(%arg0: i32) -> (i32, i32) {
    %c0_i32 = arith.constant 0 : i32
    %c0_i32_0 = arith.constant 0 : i32
    return %arg0, %c0_i32 : i32, i32
  }
}

</mosaic_0001>

<bundles_post_ra>
// kernel: predict_forward.1
= control target key start
LH: loop header
LB: loop body
LE: loop exit
PB: predicated region body
PF: predicated region fallthrough
CT: control target
= control target key end

     0   :  { %s1766_s0 = inlined_call_operand.vmem [shape: f32[4,8,32], index: 0, kind: input, shape index: {}]   ;;  %s1767_s1 = inlined_call_operand.vmem [shape: f32[32,96], index: 1, kind: input, shape index: {}]   ;;  %s1768_s2 = inlined_call_operand.vmem [shape: f32[1,96], index: 2, kind: input, shape index: {}]   ;;  %s1769_s3 = inlined_call_operand.vmem [shape: f32[32,64], index: 3, kind: input, shape index: {}]   ;;  %s1770_s4 = inlined_call_operand.vmem [shape: f32[32,32], index: 4, kind: input, shape index: {}]   ;;  %s1771_s5 = inlined_call_operand.hbm [shape: f32[32,32], index: 5, kind: input, shape index: {}]   ;;  %s1772_s6 = inlined_call_operand.vmem [shape: f32[1,32], index: 6, kind: input, shape index: {}]   ;;  %s1773_s7 = inlined_call_operand.hbm [shape: f32[32,32], index: 7, kind: input, shape index: {}]   ;;  %s1774_s8 = inlined_call_operand.vmem [shape: f32[1,32], index: 8, kind: input, shape index: {}]   ;;  %s1775_s9 = inlined_call_operand.vmem [shape: f32[32,1], index: 9, kind: input, shape index: {}]   ;;  %s1776_s10 = inlined_call_operand.<no memory space> [shape: f32[1,1], index: 10, kind: input, shape index: {}]   ;;  %s1777_s11 = inlined_call_operand.vmem [shape: f32[8,1], index: 11, kind: output, shape index: {}]  }
   0x1   :  { %v16_v0 = vstv %s1776_s10 }
   0x2   :  { %17 = vst [vmem:[#allocation2] sm:$0x1] %v16_v0 }
   0x3   :  { %18 = vsyncpa [#allocation4], 0 }
   0x4   :  { %19 = vsyncpa [#allocation6], 0  ;;  %s1495_s19 = smov [#allocation3]   ;;  %s1447_s23 = scalar_lea.hbm %s1771_s5, 512 }
   0x5   :  { %s35_s20 = sshll.u32 %s1495_s19, 4  ;;  %p1448_p0 = scmp.ne.s32.totalorder %s1771_s5, %s1447_s23  ;;  %s36_s20 = int_to_ptr.vmem [resolvable:$true] %s35_s20 }
   0x6   :  { %p1451_p1 = scmp.lt.u32.totalorder %s1447_s23, %s1771_s5 }
   0x8   :  { %p1453_p2 = pnand %p1451_p1, %p1448_p0 }
   0xa   :  { %1456 = shalt.err (!%p1453_p2)
}
   0xb   :  { %s1457_s10 = scalar_lea.vmem %s36_s20, 512  ;;  %p1462_p4 = scmp.lt.s32.totalorder %s36_s20, %s36_s20 }
   0xc   :  { %p1458_p3 = scmp.ne.s32.totalorder %s36_s20, %s1457_s10  ;;  %p1463_p5 = scmp.lt.s32.totalorder %s1457_s10, %s1457_s10 }
   0xe   :  { %p1464_p6 = por %p1463_p5, %p1462_p4 }
  0x10   :  { %p1465_p7 = pnand %p1464_p6, %p1458_p3 }
  0x12   :  { %1468 = shalt.err (!%p1465_p7)
}
  0x13   :  { %s1496_s28 = smov 128   ;;  %s1497_s29 = smov 8  }
  0x14   :  { %41 = dma.hbm_to_vmem [thread:$0]  %s1771_s5, 512, %s36_s20, [#allocation4], %s1496_s28, %s1496_s28, %s1497_s29  }
  0x15   :  { %s1498_s13 = smov [#allocation5]   ;;  %s1469_s17 = scalar_lea.hbm %s1773_s7, 512 }
  0x16   :  { %s49_s14 = sshll.u32 %s1498_s13, 4  ;;  %p1470_p8 = scmp.ne.s32.totalorder %s1773_s7, %s1469_s17  ;;  %s50_s14 = int_to_ptr.vmem [resolvable:$true] %s49_s14 }
  0x17   :  { %p1473_p9 = scmp.lt.u32.totalorder %s1469_s17, %s1773_s7 }
  0x19   :  { %p1475_p10 = pnand %p1473_p9, %p1470_p8 }
  0x1b   :  { %1478 = shalt.err (!%p1475_p10)
}
  0x1c   :  { %s1479_s23 = scalar_lea.vmem %s50_s14, 512  ;;  %p1484_p12 = scmp.lt.s32.totalorder %s50_s14, %s50_s14 }
  0x1d   :  { %p1480_p11 = scmp.ne.s32.totalorder %s50_s14, %s1479_s23  ;;  %p1485_p13 = scmp.lt.s32.totalorder %s1479_s23, %s1479_s23 }
  0x1f   :  { %p1486_p0 = por %p1485_p13, %p1484_p12 }
  0x21   :  { %p1487_p1 = pnand %p1486_p0, %p1480_p11 }
  0x23   :  { %1490 = shalt.err (!%p1487_p1)
}
  0x24   :  { %55 = dma.hbm_to_vmem [thread:$0]  %s1773_s7, 512, %s50_s14, [#allocation6], %s1496_s28, %s1496_s28, %s1497_s29  }
  0x25   :  { %1491 = dma.done.wait [#allocation4], 512  }
  0x26   :  { %1492 = vsyncadd [#allocation4], 4294966784 }
  0x27   :  { %1493 = dma.done.wait [#allocation6], 512  }
  0x28   :  { %1494 = vsyncadd [#allocation6], 4294966784  ;;  %v1499_v1 = vmov 0.0|0.0   ;;  %vm1500_vm0 = vmmov 0   ;;  %v1501_v2 = vmov 0.0   ;;  %v72_v3 = vld [vmem:[%s1767_s1] sm:$0xff] }
  0x29   :  { %1351 = vmatprep.subr.bf16.mxu1 %v1499_v1  ;;  %1230 = vmatprep.mubr.msk.f32.mxu1 %vm1500_vm0, %v1501_v2  ;;  %v73_v4 = vld [vmem:[%s1767_s1 + $0x8] sm:$0xff]  ;;  %v74_v5 = vld [vmem:[%s1767_s1 + $0x10] sm:$0xff]  ;;  %vm83_vm1 = vcmask 261120   ;;  %v75_v7 = vld [vmem:[%s1767_s1 + $0x18] sm:$0xff]  ;;  %s1504_s12 = smov 32   ;;  %vm1114_vm2 = vcmask 7168  }
  0x2a   :  { %v1343_v6 = vpack.c.bf16 %v73_v4, %v72_v3  ;;  %v181_v8 = vld [vmem:[%s1769_s3] sm:$0xff]  ;;  %v182_v9 = vld [vmem:[%s1769_s3 + $0x8] sm:$0xff]  ;;  %v1347_v10 = vpack.c.bf16 %v75_v7, %v74_v5  ;;  %v183_v13 = vld [vmem:[%s1769_s3 + $0x10] sm:$0xff] }
  0x2b   :  { %v1613_v11 = vpack.c.bf16 %v182_v9, %v181_v8  ;;  %v68_v12 = vld [vmem:[%s1766_s0] sm:$0xff]  ;;  %v184_v14 = vld [vmem:[%s1769_s3 + $0x18] sm:$0xff]  ;;  %v69_v16 = vld [vmem:[%s1766_s0 + $0x8] sm:$0xff] }
  0x2c   :  { %1344 = vmatprep.subr.bf16.mxu0 %v1343_v6  ;;  %1216 = vmatprep.mubr.msk.f32.mxu0 %vm83_vm1, %v68_v12  ;;  %v1626_v15 = vpack.c.bf16 %v184_v14, %v183_v13  ;;  %v70_v17 = vld [vmem:[%s1766_s0 + $0x10] sm:$0xff]  ;;  %v71_v18 = vld [vmem:[%s1766_s0 + $0x18] sm:$0xff]  ;;  %v265_v19 = vld [vmem:[%s1770_s4] sm:$0xff] }
  0x2d   :  { %1346 = vmatpush3.bf16.msra.mxu0 %v1343_v6  ;;  %1353 = vmatpush3.bf16.msra.mxu1 %v1613_v11  ;;  %v266_v20 = vld [vmem:[%s1770_s4 + $0x8] sm:$0xff]  ;;  %v267_v21 = vld [vmem:[%s1770_s4 + $0x10] sm:$0xff]  ;;  %v268_v23 = vld [vmem:[%s1770_s4 + $0x18] sm:$0xff]  ;;  %s1503_s4 = smov 64  }
  0x2e   :  { %1348 = vmatprep.subr.bf16.mxu0 %v1347_v10  ;;  %1354 = vmatprep.subr.bf16.mxu1 %v1499_v1  ;;  %v1662_v22 = vpack.c.bf16 %v266_v20, %v265_v19  ;;  %v1668_v24 = vpack.c.bf16 %v268_v23, %v267_v21  ;;  %v1122_v25 = vld [vmem:[%s1768_s2] ss:$0 sm:$0xff]  ;;  %s1502_s2 = smov 96  }
  0x31   :  { %1350 = vmatpush3.bf16.msra.mxu0 %v1347_v10  ;;  %1356 = vmatpush3.bf16.msra.mxu1 %v1626_v15 }
  0x32   :  { %1357 = vmatprep.subr.bf16.mxu0 %v1499_v1  ;;  %1363 = vmatprep.subr.bf16.mxu1 %v1499_v1 }
  0x34   :  { %1217 = vmatmul.mubr.msk.f32.vlgmr.msra.gmra.mrb[0].mxu0 %vm83_vm1, %v69_v16  ;;  %1231 = vmatmul.mubr.f32.vlgmr.msra.gmra.mrb[0].mxu1 %v1501_v2 }
  0x35   :  { %1219 = vmatprep.mubr.msk.f32.mxu0 %vm83_vm1, %v70_v17  ;;  %1365 = vmatpush3.bf16.msra.mxu1 %v1613_v11 }
  0x36   :  { %1366 = vmatprep.subr.bf16.mxu1 %v1499_v1  ;;  %1252 = vmatprep.mubr.msk.f32.mxu1 %vm1500_vm0, %v1501_v2 }
  0x37   :  { %1359 = vmatpush3.bf16.msra.mxu0 %v1662_v22 }
  0x38   :  { %1220 = vmatmul.mubr.msk.f32.gmra.mrb[2].mxu0 %vm83_vm1, %v71_v18  ;;  %1360 = vmatprep.subr.bf16.mxu0 %v1499_v1 }
  0x39   :  { %1241 = vmatprep.mubr.msk.f32.mxu0 %vm1500_vm0, %v1501_v2  ;;  %1368 = vmatpush3.bf16.msra.mxu1 %v1626_v15 }
  0x3a   :  { %1375 = vmatprep.subr.bf16.mxu1 %v1499_v1 }
  0x3b   :  { %1362 = vmatpush3.bf16.msra.mxu0 %v1668_v24 }
  0x3c   :  { %1369 = vmatprep.subr.bf16.mxu0 %v1499_v1 }
 0x107   :  { %v1218_v26 = vpop.f32.mrb[0].mxu0  ;;  %v254_v27 = vpop.f32.mrb[0].mxu1 }
 0x108   :  { %v1676_v28 = vadd.f32 %v1218_v26, %v1122_v25  ;;  %v162_v29 = vpop.f32.mrb[1].mxu0  ;;  %v1232_v30 = vpop.f32.mrb[1].mxu1 }
 0x109   :  { %v1678_v31 = vadd.f32 %v1122_v25, %v162_v29 }
 0x10b   :  { %v1221_v32 = vpop.f32.mrb[2].mxu0 }
 0x10c   :  { %v178_v33 = vadd.f32 %v1221_v32, %v1122_v25  ;;  %v172_v34 = vpop.f32.mrb[3].mxu0 }
 0x10d   :  { %v173_v41 = vadd.f32 %v1122_v25, %v172_v34 }
 0x10e   :  { %v255_v35 = vadd.f32 %v254_v27, %v178_v33 }
 0x110   :  { %v1127_v36 = vmul.f32 -1.442695, %v255_v35 }
 0x112   :  { %1427 = vpow2.f32 %v1127_v36 }
 0x11c   :  { %v1428_v37 = vpop.eup %1427 }
 0x11d   :  { %v261_v38 = vadd.f32 1.0, %v1428_v37 }
 0x11f   :  { %1429 = vrcp.f32 %v261_v38 }
 0x129   :  { %v1430_v39 = vpop.eup %1429 }
 0x12a   :  { %v264_v40 = vmul.f32 0.0, %v1430_v39  ;;  %v349_v47 = vsub.f32 1.0, %v1430_v39 }
 0x12c   :  { %270 = vrot.lane.b32.xlu0 %v264_v40, %s1502_s2  ;;  %v350_v50 = vmul.f32 0.0, %v349_v47  ;;  %v855_v40 = vld [vmem:[#allocation3 + $0x8] sm:$0xff] }
 0x130   :  { %273 = vrot.lane.b32.xlu0 %v178_v33, %s1503_s4 }
 0x134   :  { %440 = vrot.lane.b32.xlu0 %v173_v41, %s1503_s4 }
 0x19e   :  { %v271_v42 = vpop.permute.xlu0 %270 }
 0x19f   :  { %1242 = vmatmul.mubr.msk.f32.vlgmr.msra.gmra.mrb[4].mxu0 %vm83_vm1, %v271_v42  ;;  %v857_v42 = vld [vmem:[#allocation3 + $0x18] sm:$0xff] }
 0x1a0   :  { %1371 = vmatpush3.bf16.msra.mxu0 %v1662_v22  ;;  %1263 = vmatprep.mubr.msk.f32.mxu0 %vm1500_vm0, %v1501_v2 }
 0x1a1   :  { %1372 = vmatprep.subr.bf16.mxu0 %v1499_v1 }
 0x1a2   :  { %v274_v43 = vpop.permute.xlu0 %273 }
 0x1a4   :  { %1374 = vmatpush3.bf16.msra.mxu0 %v1668_v24 }
 0x1a5   :  { %1381 = vmatprep.subr.bf16.mxu0 %v1499_v1 }
 0x1a6   :  { %v441_v62 = vpop.permute.xlu0 %440 }
 0x272   :  { %v344_v44 = vpop.f32.mrb[4].mxu0 }
 0x273   :  { %v345_v45 = vadd.f32 %v344_v44, %v274_v43  ;;  %v1243_v46 = vpop.f32.mrb[5].mxu0  ;;  %v939_v44 = vld [vmem:[#allocation5] sm:$0xff] }
 0x275   :  { %v348_v48 = vmax.f32 %v345_v45, 0.0  ;;  %v940_v45 = vld [vmem:[#allocation5 + $0x8] sm:$0xff] }
 0x276   :  { %v1406_v46 = vpack.c.bf16 %v940_v45, %v939_v44 }
 0x277   :  { %v351_v49 = vmul.f32 %v1430_v39, %v348_v48  ;;  %v854_v39 = vld [vmem:[#allocation3] sm:$0xff] }
 0x279   :  { %v352_v51 = vadd.f32 %v351_v49, %v350_v50 }
 0x27b   :  { %432 = vrot.lane.b32.xlu1 %v352_v51, %s1504_s12  ;;  %1253 = vmatmul.mubr.msk.f32.vlgmr.msra.gmra.mrb[2].mxu1 %vm83_vm1, %v352_v51 }
 0x27c   :  { %1377 = vmatpush3.bf16.msra.mxu1 %v1613_v11  ;;  %1274 = vmatprep.mubr.msk.f32.mxu1 %vm1500_vm0, %v1501_v2 }
 0x27d   :  { %1378 = vmatprep.subr.bf16.mxu1 %v1499_v1 }
 0x280   :  { %1380 = vmatpush3.bf16.msra.mxu1 %v1626_v15 }
 0x281   :  { %1387 = vmatprep.subr.bf16.mxu1 %v1499_v1 }
 0x2ed   :  { %v433_v59 = vpop.permute.xlu1 %432 }
 0x34e   :  { %v422_v52 = vpop.f32.mrb[2].mxu1 }
 0x34f   :  { %v423_v53 = vadd.f32 %v422_v52, %v173_v41  ;;  %v1254_v54 = vpop.f32.mrb[3].mxu1  ;;  %v856_v41 = vld [vmem:[#allocation3 + $0x10] sm:$0xff] }
 0x350   :  { %v1403_v43 = vpack.c.bf16 %v857_v42, %v856_v41 }
 0x351   :  { %v1130_v55 = vmul.f32 -1.442695, %v423_v53 }
 0x353   :  { %1431 = vpow2.f32 %v1130_v55 }
 0x35d   :  { %v1432_v56 = vpop.eup %1431 }
 0x35e   :  { %v429_v57 = vadd.f32 1.0, %v1432_v56  ;;  %v941_v56 = vld [vmem:[#allocation5 + $0x10] sm:$0xff] }
 0x360   :  { %1433 = vrcp.f32 %v429_v57  ;;  %v942_v57 = vld [vmem:[#allocation5 + $0x18] sm:$0xff] }
 0x36a   :  { %v1434_v58 = vpop.eup %1433 }
 0x36b   :  { %v435_v60 = vmul.f32 %v1434_v58, %v433_v59  ;;  %v516_v4 = vsub.f32 1.0, %v1434_v58  ;;  %v1024_v59 = vld [vmem:[%s1775_s9] sm:$0xff] }
 0x36d   :  { %437 = vrot.lane.b32.xlu1 %v435_v60, %s1502_s2  ;;  %v517_v7 = vmul.f32 %v516_v4, %v352_v51  ;;  %v1025_v60 = vld [vmem:[%s1775_s9 + $0x8] sm:$0xff]  ;;  %v1026_v4 = vld [vmem:[%s1775_s9 + $0x10] sm:$0xff] }
 0x3df   :  { %v438_v61 = vpop.permute.xlu1 %437 }
 0x3e0   :  { %1264 = vmatmul.mubr.msk.f32.vlgmr.msra.gmra.mrb[6].mxu0 %vm83_vm1, %v438_v61  ;;  %v1412_v61 = vpack.c.bf16 %v1025_v60, %v1024_v59 }
 0x3e1   :  { %1383 = vmatpush3.bf16.msra.mxu0 %v1662_v22  ;;  %1285 = vmatprep.mubr.msk.f32.mxu0 %vm1500_vm0, %v1501_v2 }
 0x3e2   :  { %1384 = vmatprep.subr.bf16.mxu0 %v1499_v1 }
 0x3e5   :  { %1386 = vmatpush3.bf16.msra.mxu0 %v1668_v24 }
 0x3e6   :  { %1393 = vmatprep.subr.bf16.mxu0 %v1499_v1 }
 0x4b3   :  { %v511_v63 = vpop.f32.mrb[6].mxu0 }
 0x4b4   :  { %v512_v0 = vadd.f32 %v511_v63, %v441_v62  ;;  %v1265_v3 = vpop.f32.mrb[7].mxu0 }
 0x4b6   :  { %v515_v5 = vmax.f32 %v512_v0, 0.0 }
 0x4b8   :  { %v518_v6 = vmul.f32 %v1434_v58, %v515_v5  ;;  %v1409_v58 = vpack.c.bf16 %v942_v57, %v941_v56  ;;  %v1027_v5 = vld [vmem:[%s1775_s9 + $0x18] sm:$0xff] }
 0x4ba   :  { %v519_v8 = vadd.f32 %v518_v6, %v517_v7  ;;  %v1415_v6 = vpack.c.bf16 %v1027_v5, %v1026_v4 }
 0x4bc   :  { %599 = vrot.lane.b32.xlu1 %v519_v8, %s1504_s12  ;;  %1275 = vmatmul.mubr.msk.f32.vlgmr.msra.gmra.mrb[4].mxu1 %vm83_vm1, %v519_v8 }
 0x4bd   :  { %1389 = vmatpush3.bf16.msra.mxu1 %v1613_v11  ;;  %1296 = vmatprep.mubr.msk.f32.mxu1 %vm1500_vm0, %v1501_v2 }
 0x4be   :  { %1390 = vmatprep.subr.bf16.mxu1 %v1499_v1 }
 0x4c0   :  { %607 = vrot.lane.b32.xlu1 %v1676_v28, %s1503_s4 }
 0x4c1   :  { %1392 = vmatpush3.bf16.msra.mxu1 %v1626_v15 }
 0x4c2   :  { %1399 = vmatprep.subr.bf16.mxu1 %v1499_v1 }
 0x52e   :  { %v600_v17 = vpop.permute.xlu1 %599 }
 0x532   :  { %v608_v15 = vpop.permute.xlu1 %607 }
 0x58f   :  { %v589_v9 = vpop.f32.mrb[4].mxu1 }
 0x590   :  { %v590_v10 = vadd.f32 %v589_v9, %v1676_v28  ;;  %v1276_v12 = vpop.f32.mrb[5].mxu1 }
 0x591   :  { %v1142_v12 = vld [vmem:[#allocation2] ss:$0 sm:$0xff] }
 0x592   :  { %v1133_v13 = vmul.f32 -1.442695, %v590_v10 }
 0x594   :  { %1435 = vpow2.f32 %v1133_v13 }
 0x59e   :  { %v1436_v14 = vpop.eup %1435 }
 0x59f   :  { %v596_v11 = vadd.f32 1.0, %v1436_v14 }
 0x5a1   :  { %1437 = vrcp.f32 %v596_v11 }
 0x5ab   :  { %v1438_v16 = vpop.eup %1437 }
 0x5ac   :  { %v602_v18 = vmul.f32 %v1438_v16, %v600_v17  ;;  %v683_v25 = vsub.f32 1.0, %v1438_v16 }
 0x5ae   :  { %604 = vrot.lane.b32.xlu0 %v602_v18, %s1502_s2  ;;  %v684_v28 = vmul.f32 %v683_v25, %v519_v8 }
 0x620   :  { %v605_v19 = vpop.permute.xlu0 %604 }
 0x621   :  { %1286 = vmatmul.mubr.msk.f32.vlgmr.msra.gmra.mrb[8].mxu0 %vm83_vm1, %v605_v19 }
 0x622   :  { %1395 = vmatpush3.bf16.msra.mxu0 %v1662_v22  ;;  %1307 = vmatprep.mubr.msk.f32.mxu0 %vm1500_vm0, %v1501_v2 }
 0x623   :  { %1396 = vmatprep.subr.bf16.mxu0 %v1499_v1 }
 0x626   :  { %1398 = vmatpush3.bf16.msra.mxu0 %v1668_v24 }
 0x627   :  { %1405 = vmatprep.subr.bf16.mxu0 %v1499_v1 }
 0x6f4   :  { %v678_v20 = vpop.f32.mrb[8].mxu0 }
 0x6f5   :  { %v679_v21 = vadd.f32 %v678_v20, %v608_v15  ;;  %v1287_v23 = vpop.f32.mrb[9].mxu0 }
 0x6f7   :  { %v682_v26 = vmax.f32 %v679_v21, 0.0 }
 0x6f9   :  { %v685_v27 = vmul.f32 %v1438_v16, %v682_v26 }
 0x6fb   :  { %v686_v29 = vadd.f32 %v685_v27, %v684_v28 }
 0x6fd   :  { %766 = vrot.lane.b32.xlu0 %v686_v29, %s1504_s12  ;;  %1297 = vmatmul.mubr.msk.f32.vlgmr.msra.gmra.mrb[6].mxu1 %vm83_vm1, %v686_v29 }
 0x6fe   :  { %1318 = vmatprep.mubr.msk.f32.mxu1 %vm1500_vm0, %v1501_v2 }
 0x701   :  { %774 = vrot.lane.b32.xlu0 %v1678_v31, %s1503_s4 }
 0x76f   :  { %v767_v36 = vpop.permute.xlu0 %766 }
 0x773   :  { %v775_v47 = vpop.permute.xlu0 %774 }
 0x7d0   :  { %v756_v22 = vpop.f32.mrb[6].mxu1 }
 0x7d1   :  { %v757_v24 = vadd.f32 %v756_v22, %v1678_v31  ;;  %v1298_v30 = vpop.f32.mrb[7].mxu1  ;;  %v1400_v31 = vpack.c.bf16 %v855_v40, %v854_v39 }
 0x7d3   :  { %v1136_v32 = vmul.f32 -1.442695, %v757_v24  ;;  %1401 = vmatpush3.bf16.msra.mxu1 %v1400_v31 }
 0x7d4   :  { %1402 = vmatprep.subr.bf16.mxu1 %v1499_v1 }
 0x7d5   :  { %1439 = vpow2.f32 %v1136_v32 }
 0x7d7   :  { %1404 = vmatpush3.bf16.msra.mxu1 %v1403_v43 }
 0x7d8   :  { %1411 = vmatprep.subr.bf16.mxu1 %v1499_v1 }
 0x7df   :  { %v1440_v33 = vpop.eup %1439 }
 0x7e0   :  { %v763_v34 = vadd.f32 1.0, %v1440_v33 }
 0x7e2   :  { %1441 = vrcp.f32 %v763_v34 }
 0x7ec   :  { %v1442_v35 = vpop.eup %1441 }
 0x7ed   :  { %v769_v37 = vmul.f32 %v1442_v35, %v767_v36  ;;  %v850_v50 = vsub.f32 1.0, %v1442_v35 }
 0x7ef   :  { %771 = vrot.lane.b32.xlu1 %v769_v37, %s1502_s2  ;;  %v851_v53 = vmul.f32 %v850_v50, %v686_v29 }
 0x861   :  { %v772_v38 = vpop.permute.xlu1 %771 }
 0x862   :  { %1308 = vmatmul.mubr.msk.f32.vlgmr.msra.gmra.mrb[10].mxu0 %vm83_vm1, %v772_v38 }
 0x863   :  { %1329 = vmatprep.mubr.msk.f32.mxu0 %vm1500_vm0, %v1501_v2  ;;  %1407 = vmatpush3.bf16.msra.mxu0 %v1406_v46 }
 0x864   :  { %1408 = vmatprep.subr.bf16.mxu0 %v1499_v1 }
 0x867   :  { %1410 = vmatpush3.bf16.msra.mxu0 %v1409_v58 }
 0x935   :  { %v845_v48 = vpop.f32.mrb[10].mxu0 }
 0x936   :  { %v846_v49 = vadd.f32 %v845_v48, %v775_v47  ;;  %v1309_v51 = vpop.f32.mrb[11].mxu0 }
 0x938   :  { %v849_v52 = vmax.f32 %v846_v49, 0.0 }
 0x93a   :  { %v852_v54 = vmul.f32 %v1442_v35, %v849_v52 }
 0x93c   :  { %v853_v55 = vadd.f32 %v852_v54, %v851_v53 }
 0x93e   :  { %1319 = vmatmul.mubr.msk.f32.vlgmr.msra.gmra.mrb[8].mxu1 %vm83_vm1, %v853_v55 }
 0x93f   :  { %1340 = vmatprep.mubr.msk.f32.mxu1 %vm1500_vm0, %v1501_v2  ;;  %1413 = vmatpush3.bf16.msra.mxu1 %v1412_v61  ;;  %v1138_v2 = vld [vmem:[%s1772_s6] ss:$0 sm:$0xff] }
 0x940   :  { %1414 = vmatprep.subr.bf16.mxu1 %v1499_v1  ;;  %v1140_v1 = vld [vmem:[%s1774_s8] ss:$0 sm:$0xff] }
 0x943   :  { %1416 = vmatpush3.bf16.msra.mxu1 %v1415_v6 }
 0xa11   :  { %v934_v62 = vpop.f32.mrb[8].mxu1 }
 0xa12   :  { %v935_v63 = vadd.f32 %v1138_v2, %v934_v62  ;;  %v1320_v0 = vpop.f32.mrb[9].mxu1 }
 0xa14   :  { %v938_v3 = vmax.f32 %v935_v63, 0.0 }
 0xa16   :  { %1330 = vmatmul.mubr.msk.f32.vlgmr.msra.gmra.mrb[12].mxu0 %vm83_vm1, %v938_v3 }
 0xae9   :  { %v1019_v7 = vpop.f32.mrb[12].mxu0 }
 0xaea   :  { %v1020_v8 = vadd.f32 %v1140_v1, %v1019_v7  ;;  %v1331_v9 = vpop.f32.mrb[13].mxu0 }
 0xaec   :  { %v1023_v10 = vmax.f32 %v1020_v8, 0.0 }
 0xaee   :  { %1341 = vmatmul.mubr.msk.f32.vlgmr.msra.gmra.mrb[10].mxu1 %vm83_vm1, %v1023_v10 }
 0xbc1   :  { %v1104_v13 = vpop.f32.mrb[10].mxu1 }
 0xbc2   :  { %v1105_v14 = vadd.f32 %v1142_v12, %v1104_v13  ;;  %v1342_v11 = vpop.f32.mrb[11].mxu1 }
 0xbc4   :  { %v1144_v16 = vmul.f32 -1.442695, %v1105_v14 }
 0xbc6   :  { %1443 = vpow2.f32 %v1144_v16 }
 0xbd0   :  { %v1444_v17 = vpop.eup %1443 }
 0xbd1   :  { %v1111_v18 = vadd.f32 1.0, %v1444_v17 }
 0xbd3   :  { %1445 = vrcp.f32 %v1111_v18 }
 0xbdd   :  { %v1446_v19 = vpop.eup %1445 }
 0xbde   :  { %1115 = vst.msk [vmem:[%s1777_s11] sm:$0xff] %vm1114_vm2, %v1446_v19 }
 0xbdf   :  { %1120 = vsyncpa [#allocation4], 1 }
 0xbe0   :  { %1121 = vsyncpa [#allocation6], 1 }

</bundles_post_ra>
